<compile_context>
chip_gen: v7x
topology: tpu7x:2x2x1
jax: 0.10.0
libtpu: 0.0.40
codegen_flags: <defaults>
</compile_context>

<pallas_src>
import jax
import jax.numpy as jnp
from jax.experimental import pallas as pl
from jax.experimental.pallas import tpu as pltpu

NEG_SLOPE = 0.01   # PyTorch LeakyReLU default
BN_EPS = 1e-5      # PyTorch BatchNorm1d default


def _round_up(a, b):
    return ((a + b - 1) // b) * b


def _conv_tile(w, s):
    """K=small conv on the VPU for one lane tile.

    w: (C, K) weights, s: (K, TM) strided input slabs.
    Returns y[c, m] = sum_k w[c, k] * s[k, m]  -> (C, TM), f32.
    """
    K = w.shape[1]
    y = w[:, 0:1] * s[0:1, :]
    for k in range(1, K):
        y = y + w[:, k:k + 1] * s[k:k + 1, :]
    return y


def _stats_kernel(s_ref, w_ref, sum_ref, sumsq_ref):
    # Pass 1: per-channel sum / sum-of-squares of the conv output, accumulated
    # across the M lane tiles (outputs have constant index_map -> resident).
    i = pl.program_id(0)

    @pl.when(i == 0)
    def _():
        sum_ref[...] = jnp.zeros_like(sum_ref)
        sumsq_ref[...] = jnp.zeros_like(sumsq_ref)

    y = _conv_tile(w_ref[...], s_ref[...])                    # (C, TM)
    sum_ref[...] += jnp.sum(y, axis=1, keepdims=True)         # (C, 1)
    sumsq_ref[...] += jnp.sum(y * y, axis=1, keepdims=True)   # (C, 1)


def _norm_kernel(s_ref, w_ref, scale_ref, shift_ref, o_ref):
    # Pass 2: recompute the cheap conv, fold BN into one FMA, LeakyReLU,
    # lane-dense store of the (C, TM) tile.
    y = _conv_tile(w_ref[...], s_ref[...])                    # (C, TM)
    z = scale_ref[...] * y + shift_ref[...]                   # BN affine
    o_ref[...] = jnp.where(z >= 0, z, NEG_SLOPE * z)          # LeakyReLU


def conv_block_forward(x, weight, bias, gamma, beta, *, kernel_size, stride,
                       lane_tile=16384):
    """ConvBlock forward (training-mode BatchNorm).

    x: (B, L) f32; weight: (C_out, 1, K); gamma/beta: (C_out,).
    Returns (B, L_out, C_out) == PyTorch Conv1d->BN1d(train)->LeakyReLU->permute.
    The conv bias is mathematically cancelled by the BN mean subtraction, so it
    is not applied (saves a DMA and an add with identical forward semantics).
    """
    del bias
    B, L = x.shape
    C = weight.shape[0]
    K = kernel_size
    L_out = (L - K) // stride + 1
    M = B * L_out

    # Transposed strided slabs: slabs[k, b*L_out + j] = x[b, j*stride + k].
    # M sits on the lane axis -> dense loads and dense stores.
    x = x.astype(jnp.float32)
    last = stride * (L_out - 1) + 1
    slabs = jnp.stack([x[:, k:k + last:stride] for k in range(K)], axis=0)
    slabs = slabs.reshape(K, M)

    # Lane tiling over M; zero-pad (zero columns contribute zero to the stats
    # since there is no bias term, so dividing by the true M is exact).
    tm = min(lane_tile, _round_up(M, 128))
    m_pad = _round_up(M, tm)
    if m_pad != M:
        slabs = jnp.pad(slabs, ((0, 0), (0, m_pad - M)))
    n_tiles = m_pad // tm

    w_mat = weight[:, 0, :].astype(jnp.float32)               # (C, K)

    slab_spec = pl.BlockSpec((K, tm), lambda i: (0, i))
    w_spec = pl.BlockSpec((C, K), lambda i: (0, 0))
    vec_spec = pl.BlockSpec((C, 1), lambda i: (0, 0))

    # ---- pass 1: per-channel sum / sum-of-squares -------------------------
    sums, sumsqs = pl.pallas_call(
        _stats_kernel,
        out_shape=(jax.ShapeDtypeStruct((C, 1), jnp.float32),
                   jax.ShapeDtypeStruct((C, 1), jnp.float32)),
        grid=(n_tiles,),
        in_specs=[slab_spec, w_spec],
        out_specs=(vec_spec, vec_spec),
        compiler_params=pltpu.CompilerParams(
            dimension_semantics=("arbitrary",)),
        cost_estimate=pl.CostEstimate(
            flops=2 * m_pad * K * C + 4 * m_pad * C,
            transcendentals=0,
            bytes_accessed=4 * (K * m_pad + C * K + 2 * C)),
    )(slabs, w_mat)

    # ---- tiny per-channel BN math (C scalars, plain JAX) -------------------
    mean = sums / M                                           # (C, 1)
    var = jnp.maximum(sumsqs / M - mean * mean, 0.0)          # biased var (fwd)
    inv_std = jax.lax.rsqrt(var + BN_EPS)
    g = gamma.reshape(C, 1).astype(jnp.float32)
    b = beta.reshape(C, 1).astype(jnp.float32)
    scale = g * inv_std                                       # (C, 1)
    shift = b - mean * scale                                  # (C, 1)

    # ---- pass 2: conv (recomputed, ~free) + BN affine + LeakyReLU ----------
    out_cm = pl.pallas_call(
        _norm_kernel,
        out_shape=jax.ShapeDtypeStruct((C, m_pad), jnp.float32),
        grid=(n_tiles,),
        in_specs=[slab_spec, w_spec, vec_spec, vec_spec],
        out_specs=pl.BlockSpec((C, tm), lambda i: (0, i)),
        compiler_params=pltpu.CompilerParams(
            dimension_semantics=("parallel",)),
        cost_estimate=pl.CostEstimate(
            flops=2 * m_pad * K * C + 3 * m_pad * C,
            transcendentals=0,
            bytes_accessed=4 * (K * m_pad + C * m_pad + C * K + 2 * C)),
    )(slabs, w_mat, scale, shift)

    # (C, M) -> (C, B, L_out) -> (B, L_out, C)  == PyTorch permute(0, 2, 1)
    out = out_cm[:, :M].reshape(C, B, L_out).transpose(1, 2, 0)
    # TODO(synk): BatchNorm1d running_mean/running_var momentum update (module
    # buffer state) is not produced; only the forward output is computed.
    return out


def _reference(x, weight, bias, gamma, beta, kernel_size, stride):
    """Plain-JAX replica of the PyTorch forward (with bias, direct var)."""
    B, L = x.shape
    K = kernel_size
    L_out = (L - K) // stride + 1
    idx = jnp.arange(L_out)[:, None] * stride + jnp.arange(K)[None, :]
    patches = x[:, idx]                                       # (B, L_out, K)
    y = jnp.einsum("blk,ck->bcl", patches, weight[:, 0, :])
    y = y + bias[None, :, None]                               # (B, C, L_out)
    mean = jnp.mean(y, axis=(0, 2), keepdims=True)
    var = jnp.mean((y - mean) ** 2, axis=(0, 2), keepdims=True)
    yh = (y - mean) * jax.lax.rsqrt(var + BN_EPS)
    z = gamma[None, :, None] * yh + beta[None, :, None]
    z = jnp.where(z >= 0, z, NEG_SLOPE * z)
    return z.transpose(0, 2, 1)                               # (B, L_out, C)


if __name__ == "__main__":
    in_channels = 1          # forced by x.unsqueeze(1) in the module
    out_channels = 8
    kernel_size = 3
    stride = 2

    B, L = 2, 16
    key = jax.random.PRNGKey(0)
    k_x, k_w, k_b = jax.random.split(key, 3)

    x = jax.random.normal(k_x, (B, L), dtype=jnp.float32)
    weight = 0.02 * jax.random.normal(
        k_w, (out_channels, in_channels, kernel_size), dtype=jnp.float32)
    fan_in = in_channels * kernel_size
    bound = 1.0 / (fan_in ** 0.5)
    bias = jax.random.uniform(k_b, (out_channels,), minval=-bound,
                              maxval=bound, dtype=jnp.float32)
    gamma = jnp.ones((out_channels,), dtype=jnp.float32)
    beta = jnp.zeros((out_channels,), dtype=jnp.float32)

    y = conv_block_forward(x, weight, bias, gamma, beta,
                           kernel_size=kernel_size, stride=stride)
    jax.block_until_ready(y)

    L_out = (L - kernel_size) // stride + 1
    assert y.shape == (B, L_out, out_channels), y.shape
    assert bool(jnp.all(jnp.isfinite(y)))

    y_ref = _reference(x, weight, bias, gamma, beta, kernel_size, stride)
    assert bool(jnp.allclose(y, y_ref, rtol=1e-3, atol=1e-3)), float(
        jnp.max(jnp.abs(y - y_ref)))

    print("KERNEL_OK")
</pallas_src>

<mosaic_0001>
module attributes {stable_mosaic.version = 11 : i64} {
  func.func @_stats_kernel(%arg0: i32, %arg1: memref<3x128xf32, #tpu.memory_space<vmem>>, %arg2: memref<8x3xf32, #tpu.memory_space<vmem>>, %arg3: memref<8x1xf32, #tpu.memory_space<vmem>>, %arg4: memref<8x1xf32, #tpu.memory_space<vmem>>) attributes {dimension_semantics = [#tpu.dimension_semantics<arbitrary>], iteration_bounds = array<i64: 1>, scalar_prefetch = 0 : i64, scratch_operands = 0 : i64, tpu.core_type = #tpu.core_type<tc>, window_params = [{transform_indices = @transform_0, window_bounds = array<i64: 3, 128>}, {pipeline_mode = #tpu.pipeline_mode<synchronous>, transform_indices = @transform_1, window_bounds = array<i64: 8, 3>}, {pipeline_mode = #tpu.pipeline_mode<synchronous>, transform_indices = @transform_2, window_bounds = array<i64: 8, 1>}, {pipeline_mode = #tpu.pipeline_mode<synchronous>, transform_indices = @transform_3, window_bounds = array<i64: 8, 1>}]} {
    %c0_i32 = arith.constant 0 : i32
    %0 = arith.cmpi eq, %arg0, %c0_i32 : i32
    %1 = arith.extui %0 : i1 to i32
    %c0_i32_0 = arith.constant 0 : i32
    %2 = arith.cmpi ne, %1, %c0_i32_0 : i32
    scf.if %2 {
      %cst_13 = arith.constant 0.000000e+00 : f32
      %33 = vector.broadcast %cst_13 : f32 to vector<8x1xf32>
      %c0_14 = arith.constant 0 : index
      %c0_15 = arith.constant 0 : index
      %34 = vector.load %arg3[%c0_14, %c0_15] : memref<8x1xf32, #tpu.memory_space<vmem>>, vector<8x1xf32>
      tpu.vector_store %arg3[%c0_14, %c0_15], %33 {strides = array<i32>} : memref<8x1xf32, #tpu.memory_space<vmem>>, vector<8x1xf32>,
      %cst_16 = arith.constant 0.000000e+00 : f32
      %35 = vector.broadcast %cst_16 : f32 to vector<8x1xf32>
      %c0_17 = arith.constant 0 : index
      %c0_18 = arith.constant 0 : index
      %36 = vector.load %arg4[%c0_17, %c0_18] : memref<8x1xf32, #tpu.memory_space<vmem>>, vector<8x1xf32>
      tpu.vector_store %arg4[%c0_17, %c0_18], %35 {strides = array<i32>} : memref<8x1xf32, #tpu.memory_space<vmem>>, vector<8x1xf32>,
    } else {
    }
    %c0 = arith.constant 0 : index
    %c0_1 = arith.constant 0 : index
    %3 = vector.load %arg2[%c0, %c0_1] : memref<8x3xf32, #tpu.memory_space<vmem>>, vector<8x3xf32>
    %c0_2 = arith.constant 0 : index
    %c0_3 = arith.constant 0 : index
    %4 = vector.load %arg1[%c0_2, %c0_3] : memref<3x128xf32, #tpu.memory_space<vmem>>, vector<3x128xf32>
    %5 = vector.extract_strided_slice %3 {offsets = [0, 0], sizes = [8, 1], strides = [1, 1]} : vector<8x3xf32> to vector<8x1xf32>
    %6 = vector.extract_strided_slice %4 {offsets = [0, 0], sizes = [1, 128], strides = [1, 1]} : vector<3x128xf32> to vector<1x128xf32>
    %7 = vector.broadcast %5 : vector<8x1xf32> to vector<8x128xf32>
    %8 = vector.broadcast %6 : vector<1x128xf32> to vector<8x128xf32>
    %9 = arith.mulf %7, %8 : vector<8x128xf32>
    %10 = vector.extract_strided_slice %3 {offsets = [0, 1], sizes = [8, 1], strides = [1, 1]} : vector<8x3xf32> to vector<8x1xf32>
    %11 = vector.extract_strided_slice %4 {offsets = [1, 0], sizes = [1, 128], strides = [1, 1]} : vector<3x128xf32> to vector<1x128xf32>
    %12 = vector.broadcast %10 : vector<8x1xf32> to vector<8x128xf32>
    %13 = vector.broadcast %11 : vector<1x128xf32> to vector<8x128xf32>
    %14 = arith.mulf %12, %13 : vector<8x128xf32>
    %15 = arith.addf %9, %14 : vector<8x128xf32>
    %16 = vector.extract_strided_slice %3 {offsets = [0, 2], sizes = [8, 1], strides = [1, 1]} : vector<8x3xf32> to vector<8x1xf32>
    %17 = vector.extract_strided_slice %4 {offsets = [2, 0], sizes = [1, 128], strides = [1, 1]} : vector<3x128xf32> to vector<1x128xf32>
    %18 = vector.broadcast %16 : vector<8x1xf32> to vector<8x128xf32>
    %19 = vector.broadcast %17 : vector<1x128xf32> to vector<8x128xf32>
    %20 = arith.mulf %18, %19 : vector<8x128xf32>
    %21 = arith.addf %15, %20 : vector<8x128xf32>
    %c0_4 = arith.constant 0 : index
    %c0_5 = arith.constant 0 : index
    %22 = vector.load %arg3[%c0_4, %c0_5] : memref<8x1xf32, #tpu.memory_space<vmem>>, vector<8x1xf32>
    %cst = arith.constant dense<0.000000e+00> : vector<8xf32>
    %23 = vector.multi_reduction <add>, %21, %cst [1] : vector<8x128xf32> to vector<8xf32>
    %24 = vector.shape_cast %23 : vector<8xf32> to vector<8x1xf32>
    %25 = arith.addf %22, %24 : vector<8x1xf32>
    %c0_6 = arith.constant 0 : index
    %c0_7 = arith.constant 0 : index
    %26 = vector.load %arg3[%c0_6, %c0_7] : memref<8x1xf32, #tpu.memory_space<vmem>>, vector<8x1xf32>
    tpu.vector_store %arg3[%c0_6, %c0_7], %25 {strides = array<i32>} : memref<8x1xf32, #tpu.memory_space<vmem>>, vector<8x1xf32>,
    %c0_8 = arith.constant 0 : index
    %c0_9 = arith.constant 0 : index
    %27 = vector.load %arg4[%c0_8, %c0_9] : memref<8x1xf32, #tpu.memory_space<vmem>>, vector<8x1xf32>
    %28 = arith.mulf %21, %21 : vector<8x128xf32>
    %cst_10 = arith.constant dense<0.000000e+00> : vector<8xf32>
    %29 = vector.multi_reduction <add>, %28, %cst_10 [1] : vector<8x128xf32> to vector<8xf32>
    %30 = vector.shape_cast %29 : vector<8xf32> to vector<8x1xf32>
    %31 = arith.addf %27, %30 : vector<8x1xf32>
    %c0_11 = arith.constant 0 : index
    %c0_12 = arith.constant 0 : index
    %32 = vector.load %arg4[%c0_11, %c0_12] : memref<8x1xf32, #tpu.memory_space<vmem>>, vector<8x1xf32>
    tpu.vector_store %arg4[%c0_11, %c0_12], %31 {strides = array<i32>} : memref<8x1xf32, #tpu.memory_space<vmem>>, vector<8x1xf32>,
    return
  }
  func.func @transform_0(%arg0: i32) -> (i32, i32) {
    %c0_i32 = arith.constant 0 : i32
    %c0_i32_0 = arith.constant 0 : i32
    return %c0_i32, %arg0 : i32, i32
  }
  func.func @transform_1(%arg0: i32) -> (i32, i32) {
    %c0_i32 = arith.constant 0 : i32
    %c0_i32_0 = arith.constant 0 : i32
    %c0_i32_1 = arith.constant 0 : i32
    return %c0_i32, %c0_i32_0 : i32, i32
  }
  func.func @transform_2(%arg0: i32) -> (i32, i32) {
    %c0_i32 = arith.constant 0 : i32
    %c0_i32_0 = arith.constant 0 : i32
    %c0_i32_1 = arith.constant 0 : i32
    return %c0_i32, %c0_i32_0 : i32, i32
  }
  func.func @transform_3(%arg0: i32) -> (i32, i32) {
    %c0_i32 = arith.constant 0 : i32
    %c0_i32_0 = arith.constant 0 : i32
    %c0_i32_1 = arith.constant 0 : i32
    return %c0_i32, %c0_i32_0 : i32, i32
  }
}

</mosaic_0001>

<bundles_post_ra>
// kernel: tpu_custom_call.1
= control target key start
LH: loop header
LB: loop body
LE: loop exit
PB: predicated region body
PF: predicated region fallthrough
CT: control target
= control target key end

     0   :  { %v80_v0 = vmov 0   ;;  %v81_v2 = vmov 2   ;;  %v82_v3 = vmov 1   ;;  %vm17_vm0 = vcmask 7168   ;;  %s132_s1 = inlined_call_operand.vmem [shape: f32[8,3], index: 1, kind: input, shape index: {}]   ;;  %s133_s2 = inlined_call_operand.vmem [shape: f32[8,1], index: 2, kind: output, shape index: {0}]   ;;  %s134_s0 = inlined_call_operand.vmem [shape: f32[3,128], index: 0, kind: input, shape index: {}]   ;;  %s135_s3 = inlined_call_operand.vmem [shape: f32[8,1], index: 3, kind: output, shape index: {1}]  }
   0x1   :  { %76 = vset.pattern.permute.xlu0 %v80_v0  ;;  %v20_v1 = vld [vmem:[%s132_s1] sm:$0xff]  ;;  %78 = vset.pattern.permute.xlu1 %v81_v2  ;;  %v83_v4 = vmov 0.0   ;;  %v27_v5 = vlaneseq }
   0x2   :  { %24 = vperm.xlu0 %76, %v20_v1   ;;  %43 = vperm.xlu1 %78, %v20_v1   ;;  %18 = vst.msk [vmem:[%s133_s2] sm:$0xff] %vm17_vm0, %v83_v4  ;;  %v21_v10 = vld [vmem:[%s134_s0] sm:$0x7]  ;;  %19 = vst.msk [vmem:[%s135_s3] sm:$0xff] %vm17_vm0, %v83_v4 }
   0x3   :  { %v28_v6 = vshrl.u32 %v27_v5, 7 }
   0x5   :  { %v29_v7 = vsub.s32 0, %v28_v6  ;;  %v38_v8 = vsub.s32 1, %v28_v6  ;;  %v48_v9 = vsub.s32 2, %v28_v6 }
   0x6   :  { %77 = vset.pattern.permute.xlu0 %v82_v3 }
   0x7   :  { %33 = vperm.xlu0 %77, %v20_v1   ;;  %v30_v12 = vrot.slane %v21_v10, %v29_v7  ;;  %v39_v13 = vrot.slane %v21_v10, %v38_v8  ;;  %v49_v14 = vrot.slane %v21_v10, %v48_v9 }
   0x9   :  { %v52_v23 = vld [vmem:[%s133_s2] sm:$0xff] }
   0xa   :  { %v58_v25 = vld [vmem:[%s135_s3] sm:$0xff] }
   0xb   :  { %79 = vset.pattern.permute.xlu0 %v81_v2 }
  0x81   :  { %v25_v11 = vpop.permute.xlu0 %24  ;;  %v44_v15 = vpop.permute.xlu1 %43 }
  0x82   :  { %v31_v17 = vmul.f32 %v30_v12, %v25_v11  ;;  %v50_v19 = vmul.f32 %v49_v14, %v44_v15 }
  0x86   :  { %v34_v16 = vpop.permute.xlu0 %33 }
  0x87   :  { %v40_v18 = vmul.f32 %v39_v13, %v34_v16 }
  0x89   :  { %v41_v20 = vadd.f32 %v40_v18, %v31_v17 }
  0x8b   :  { %v51_v21 = vadd.f32 %v50_v19, %v41_v20 }
  0x8d   :  { %53 = vadd.xlane.f32.xlu1 %v51_v21  ;;  %v59_v22 = vmul.f32 %v51_v21, %v51_v21 }
  0x8f   :  { %60 = vadd.xlane.f32.xlu0 %v59_v22 }
 0x11a   :  { %v54_v24 = vpop.xlane.xlu1 %53 }
 0x11b   :  { %v55_v26 = vadd.f32 %v54_v24, %v52_v23 }
 0x11c   :  { %v61_v27 = vpop.xlane.xlu0 %60 }
 0x11d   :  { %57 = vst.msk [vmem:[%s133_s2] sm:$0xff] %vm17_vm0, %v55_v26  ;;  %v62_v28 = vadd.f32 %v61_v27, %v58_v25 }
 0x11f   :  { %63 = vst.msk [vmem:[%s135_s3] sm:$0xff] %vm17_vm0, %v62_v28 }

</bundles_post_ra>
